<compile_context>
chip_gen: v7x
topology: tpu7x:2x2x1
jax: 0.10.0
libtpu: 0.0.40
codegen_flags: <defaults>
</compile_context>

<pallas_src>
import math

import jax
import jax.numpy as jnp
from jax.experimental import pallas as pl
from jax.experimental.pallas import tpu as pltpu

# ----------------------------- configuration --------------------------------
B = 2             # batch
T = 8             # block_size (context length)
C = 32            # num_embed
H = 4             # attention_num_heads
HEAD = C // H     # per-head size
HID = 4 * C       # FeedForward hidden dim
LN_EPS = 1e-5     # nn.LayerNorm default
BT = B * T        # flattened rows
HT = H * T        # stacked per-head key/value rows

# ------------------------- parameter-slab layout ------------------------------
LANES = 128                        # lane-pad every row block to one full vreg width
assert 3 * C <= LANES and HID <= LANES and HT <= LANES
R_QKV = 0                          # (C, 3C)   [wq/sqrt(HEAD) | wk | wv]
R_WO = R_QKV + C                   # (C, C)    attention output projection
R_W1 = R_WO + C                    # (C, HID)  FFN up
R_W2 = R_W1 + C                    # (HID, C)  FFN down
R_VEC = R_W2 + HID                 # (8, 128)  rows: b1 | bo | b2 | g1 | be1 | g2 | be2
R_MASK = R_VEC + 8                 # (T, HT)   additive causal bias, tiled per head
R_SEG = R_MASK + T                 # (HT, C)   per-head 0/1 channel mask
R_SUM = R_SEG + HT                 # (HT, HT)  block-diag ones(T,T): segment-sum matrix
SLAB_ROWS = R_SUM + HT             # 304 rows -> 304*128*4 B ~= 152 KiB
assert SLAB_ROWS % 8 == 0
assert all(r % 8 == 0 for r in (R_QKV, R_WO, R_W1, R_W2, R_VEC, R_MASK, R_SEG, R_SUM))


# ------------------------------- kernel --------------------------------------
def _layernorm(v, gamma, beta):
    mu = jnp.mean(v, axis=-1, keepdims=True)
    var = jnp.mean((v - mu) ** 2, axis=-1, keepdims=True)
    return (v - mu) * jax.lax.rsqrt(var + LN_EPS) * gamma + beta


def transformer_block_kernel(x_ref, slab_ref, o_ref):
    x = x_ref[...]                                            # (BT, C) f32

    # Static slab slices (sublane offsets multiples of 8, lane offsets 0 -> no relayout).
    wqkv = slab_ref[R_QKV:R_QKV + C, 0:3 * C]                 # (C, 3C)
    wo = slab_ref[R_WO:R_WO + C, 0:C]                         # (C, C)
    w1 = slab_ref[R_W1:R_W1 + C, 0:HID]                       # (C, HID)
    w2 = slab_ref[R_W2:R_W2 + HID, 0:C]                       # (HID, C)
    vecs = slab_ref[R_VEC:R_VEC + 8, :]                       # (8, 128)
    b1 = vecs[0:1, 0:HID]
    bo = vecs[1:2, 0:C]
    b2 = vecs[2:3, 0:C]
    g1, be1 = vecs[3:4, 0:C], vecs[4:5, 0:C]
    g2, be2 = vecs[5:6, 0:C], vecs[6:7, 0:C]
    mask_bias = slab_ref[R_MASK:R_MASK + T, 0:HT]             # (T, HT)  0 / -1e30
    seg_mask = slab_ref[R_SEG:R_SEG + HT, 0:C]                # (HT, C)  head channel mask
    sum_seg = slab_ref[R_SUM:R_SUM + HT, 0:HT]                # (HT, HT) block-diag ones

    # ---- x = x + attention(ln1(x)) ----
    xn = _layernorm(x, g1, be1)
    qkv = jnp.dot(xn, wqkv, preferred_element_type=jnp.float32)   # (BT, 3C)
    q = qkv[:, 0:C]                 # 1/sqrt(HEAD) already folded into the Q weights
    k = qkv[:, C:2 * C]
    v = qkv[:, 2 * C:3 * C]

    head_outs = []
    for b in range(B):                                        # static unrolled, B=2
        r0 = b * T
        kb = k[r0:r0 + T, :]                                  # (T, C) sublane slices
        vb = v[r0:r0 + T, :]
        # Head-block row stacks: row h*T+tk holds key/value tk with only head-h channels.
        k_rows = jnp.concatenate([kb] * H, axis=0) * seg_mask     # (HT, C)
        v_rows = jnp.concatenate([vb] * H, axis=0) * seg_mask     # (HT, C)
        # All head scores in ONE push: s[t, h*T+tk] = q_h[t] . k_h[tk]  (scale folded).
        s = jax.lax.dot_general(q[r0:r0 + T, :], k_rows,
                                (((1,), (1,)), ((), ())),
                                preferred_element_type=jnp.float32)   # (T, HT)
        s = s + mask_bias
        # Row max over all heads is a valid (>= per-segment) softmax stabilizer.
        m = jnp.max(s, axis=-1, keepdims=True)
        p = jnp.exp(s - m)
        # Per-head segment sums, broadcast back across the segment, in ONE push.
        denom = jnp.dot(p, sum_seg, preferred_element_type=jnp.float32)
        p = p * pl.reciprocal(denom, approx=True)
        # All head outputs in ONE push; lanes land in head-concatenated channel order.
        head_outs.append(jnp.dot(p, v_rows, preferred_element_type=jnp.float32))  # (T, C)
    o_all = jnp.concatenate(head_outs, axis=0)                # (BT, C) sublane concat
    x = x + jnp.dot(o_all, wo, preferred_element_type=jnp.float32) + bo

    # ---- x = x + ff(ln2(x)) ----
    xn2 = _layernorm(x, g2, be2)
    h1 = jnp.maximum(jnp.dot(xn2, w1, preferred_element_type=jnp.float32) + b1, 0.0)
    ff = jnp.dot(h1, w2, preferred_element_type=jnp.float32) + b2

    # TODO(synk): present a lane-dense (multiple-of-128) output layout once BT*C grows;
    #             negligible for a (16, 32) store.
    o_ref[...] = (x + ff).astype(o_ref.dtype)


# ------------------------------ param packing --------------------------------
def pack_params(params):
    """Pack the 13 logical parameters + attention constants into one (SLAB_ROWS, 128) slab."""
    (wq, wk, wv, wo, bo, w1, b1, w2, b2, g1, be1, g2, be2) = params
    scale = 1.0 / math.sqrt(HEAD)

    slab = jnp.zeros((SLAB_ROWS, LANES), jnp.float32)

    def put(s, r, block):
        rows, cols = block.shape
        return s.at[r:r + rows, 0:cols].set(block.astype(jnp.float32))

    slab = put(slab, R_QKV, jnp.concatenate([wq * scale, wk, wv], axis=1))
    slab = put(slab, R_WO, wo)
    slab = put(slab, R_W1, w1)
    slab = put(slab, R_W2, w2)
    for i, vec in enumerate((b1, bo, b2, g1, be1, g2, be2)):
        slab = put(slab, R_VEC + i, vec)

    # Additive causal bias (0 on/below diagonal, -1e30 above), tiled once per head.
    rows = jnp.arange(T)[:, None]
    cols = jnp.arange(T)[None, :]
    causal = jnp.where(cols <= rows, 0.0, -1e30).astype(jnp.float32)          # (T, T)
    slab = put(slab, R_MASK, jnp.tile(causal, (1, H)))                        # (T, HT)

    # seg_mask[h*T + tk, c] = 1 iff channel c belongs to head h.
    seg = (jnp.arange(HT)[:, None] // T == jnp.arange(C)[None, :] // HEAD)
    slab = put(slab, R_SEG, seg.astype(jnp.float32))                          # (HT, C)

    # sum_seg[j, j'] = 1 iff j and j' fall in the same head segment.
    idx = jnp.arange(HT)
    slab = put(slab, R_SUM, (idx[:, None] // T == idx[None, :] // T).astype(jnp.float32))
    return slab


# ------------------------------- wrapper --------------------------------------
@jax.jit
def transformer_block(x, slab):
    xf = x.reshape(BT, C)      # exact: LN/QKV/proj/FFN are row-wise; attention batches
                               # are handled in-kernel on contiguous row groups.
    out = pl.pallas_call(
        transformer_block_kernel,
        out_shape=jax.ShapeDtypeStruct((BT, C), x.dtype),
        # No grid: a single step with whole-array VMEM residency, single-buffered
        # (nothing to pipeline -> no dead second buffer, only 2 input DMAs).
        in_specs=[pl.BlockSpec(memory_space=pltpu.MemorySpace.VMEM),
                  pl.BlockSpec(memory_space=pltpu.MemorySpace.VMEM)],
        out_specs=pl.BlockSpec(memory_space=pltpu.MemorySpace.VMEM),
    )(xf, slab)
    return out.reshape(B, T, C)


# ---------------------------- pure-JAX reference -----------------------------
def transformer_block_ref(x, params):
    (wq, wk, wv, wo, bo, w1, b1, w2, b2, g1, be1, g2, be2) = params

    def ln(v, g, b):
        mu = jnp.mean(v, axis=-1, keepdims=True)
        var = jnp.mean((v - mu) ** 2, axis=-1, keepdims=True)
        return (v - mu) / jnp.sqrt(var + LN_EPS) * g + b

    xn = ln(x, g1[0], be1[0])
    q = xn @ wq
    k = xn @ wk
    v = xn @ wv
    qh = q.reshape(B, T, H, HEAD).transpose(0, 2, 1, 3)
    kh = k.reshape(B, T, H, HEAD).transpose(0, 2, 1, 3)
    vh = v.reshape(B, T, H, HEAD).transpose(0, 2, 1, 3)
    s = jnp.einsum("bhqd,bhkd->bhqk", qh, kh) / math.sqrt(HEAD)
    mask = jnp.tril(jnp.ones((T, T), dtype=bool))
    s = jnp.where(mask, s, -jnp.inf)
    p = jax.nn.softmax(s, axis=-1)
    o = jnp.einsum("bhqk,bhkd->bhqd", p, vh).transpose(0, 2, 1, 3).reshape(B, T, C)
    x = x + o @ wo + bo[0]
    xn2 = ln(x, g2[0], be2[0])
    ff = jnp.maximum(xn2 @ w1 + b1[0], 0.0) @ w2 + b2[0]
    return x + ff


# --------------------------------- main ---------------------------------------
if __name__ == "__main__":
    key = jax.random.PRNGKey(0)
    ks = jax.random.split(key, 10)

    def init(k, shape, scale=0.02):
        return (scale * jax.random.normal(k, shape)).astype(jnp.float32)

    # Per-head q/k/v projections concatenated along the output dim -> (C, C),
    # stored already transposed so the kernel computes x @ W.
    wq = init(ks[0], (C, C))
    wk = init(ks[1], (C, C))
    wv = init(ks[2], (C, C))
    wo = init(ks[3], (C, C))
    bo = init(ks[4], (1, C))
    w1 = init(ks[5], (C, HID))
    b1 = init(ks[6], (1, HID))
    w2 = init(ks[7], (HID, C))
    b2 = init(ks[8], (1, C))
    # nn.LayerNorm defaults: gamma = 1, beta = 0.
    g1 = jnp.ones((1, C), jnp.float32)
    be1 = jnp.zeros((1, C), jnp.float32)
    g2 = jnp.ones((1, C), jnp.float32)
    be2 = jnp.zeros((1, C), jnp.float32)
    params = (wq, wk, wv, wo, bo, w1, b1, w2, b2, g1, be1, g2, be2)

    x = jax.random.normal(ks[9], (B, T, C), dtype=jnp.float32)

    slab = pack_params(params)
    out = transformer_block(x, slab)
    out = jax.block_until_ready(out)

    ref = transformer_block_ref(x, params)
    assert out.shape == (B, T, C)
    # Tolerance absorbs the EUP approximate reciprocal in the softmax denominator
    # (error contribution is O(1e-5..1e-4) on this config).
    assert jnp.allclose(out, ref, atol=1e-3, rtol=1e-3), "mismatch vs pure-JAX reference"

    print("KERNEL_OK")
</pallas_src>

<mosaic_0001>
module attributes {stable_mosaic.version = 11 : i64} {
  func.func @transformer_block_kernel(%arg0: memref<16x32xf32, #tpu.memory_space<vmem>>, %arg1: memref<304x128xf32, #tpu.memory_space<vmem>>, %arg2: memref<16x32xf32, #tpu.memory_space<vmem>>) attributes {dimension_semantics = [], scalar_prefetch = 0 : i64, scratch_operands = 0 : i64, tpu.core_type = #tpu.core_type<tc>} {
    %c0 = arith.constant 0 : index
    %c0_0 = arith.constant 0 : index
    %0 = vector.load %arg0[%c0, %c0_0] : memref<16x32xf32, #tpu.memory_space<vmem>>, vector<16x32xf32>
    %c0_1 = arith.constant 0 : index
    %c0_2 = arith.constant 0 : index
    %1 = vector.load %arg1[%c0_1, %c0_2] : memref<304x128xf32, #tpu.memory_space<vmem>>, vector<32x96xf32>
    %c32 = arith.constant 32 : index
    %c0_3 = arith.constant 0 : index
    %2 = vector.load %arg1[%c32, %c0_3] : memref<304x128xf32, #tpu.memory_space<vmem>>, vector<32x32xf32>
    %c64 = arith.constant 64 : index
    %c0_4 = arith.constant 0 : index
    %3 = vector.load %arg1[%c64, %c0_4] : memref<304x128xf32, #tpu.memory_space<vmem>>, vector<32x128xf32>
    %c96 = arith.constant 96 : index
    %c0_5 = arith.constant 0 : index
    %4 = vector.load %arg1[%c96, %c0_5] : memref<304x128xf32, #tpu.memory_space<vmem>>, vector<128x32xf32>
    %c224 = arith.constant 224 : index
    %c0_6 = arith.constant 0 : index
    %5 = vector.load %arg1[%c224, %c0_6] : memref<304x128xf32, #tpu.memory_space<vmem>>, vector<8x128xf32>
    %6 = vector.extract_strided_slice %5 {offsets = [0, 0], sizes = [1, 128], strides = [1, 1]} : vector<8x128xf32> to vector<1x128xf32>
    %7 = vector.extract_strided_slice %5 {offsets = [1, 0], sizes = [1, 32], strides = [1, 1]} : vector<8x128xf32> to vector<1x32xf32>
    %8 = vector.extract_strided_slice %5 {offsets = [2, 0], sizes = [1, 32], strides = [1, 1]} : vector<8x128xf32> to vector<1x32xf32>
    %9 = vector.extract_strided_slice %5 {offsets = [3, 0], sizes = [1, 32], strides = [1, 1]} : vector<8x128xf32> to vector<1x32xf32>
    %10 = vector.extract_strided_slice %5 {offsets = [4, 0], sizes = [1, 32], strides = [1, 1]} : vector<8x128xf32> to vector<1x32xf32>
    %11 = vector.extract_strided_slice %5 {offsets = [5, 0], sizes = [1, 32], strides = [1, 1]} : vector<8x128xf32> to vector<1x32xf32>
    %12 = vector.extract_strided_slice %5 {offsets = [6, 0], sizes = [1, 32], strides = [1, 1]} : vector<8x128xf32> to vector<1x32xf32>
    %c232 = arith.constant 232 : index
    %c0_7 = arith.constant 0 : index
    %13 = vector.load %arg1[%c232, %c0_7] : memref<304x128xf32, #tpu.memory_space<vmem>>, vector<8x32xf32>
    %c240 = arith.constant 240 : index
    %c0_8 = arith.constant 0 : index
    %14 = vector.load %arg1[%c240, %c0_8] : memref<304x128xf32, #tpu.memory_space<vmem>>, vector<32x32xf32>
    %c272 = arith.constant 272 : index
    %c0_9 = arith.constant 0 : index
    %15 = vector.load %arg1[%c272, %c0_9] : memref<304x128xf32, #tpu.memory_space<vmem>>, vector<32x32xf32>
    %cst = arith.constant dense<0.000000e+00> : vector<16xf32>
    %16 = vector.multi_reduction <add>, %0, %cst [1] : vector<16x32xf32> to vector<16xf32>
    %17 = vector.shape_cast %16 : vector<16xf32> to vector<16x1xf32>
    %cst_10 = arith.constant 3.200000e+01 : f32
    %18 = vector.broadcast %cst_10 : f32 to vector<16x1xf32>
    %19 = arith.divf %17, %18 : vector<16x1xf32>
    %20 = vector.broadcast %19 : vector<16x1xf32> to vector<16x32xf32>
    %21 = arith.subf %0, %20 : vector<16x32xf32>
    %22 = arith.mulf %21, %21 : vector<16x32xf32>
    %cst_11 = arith.constant dense<0.000000e+00> : vector<16xf32>
    %23 = vector.multi_reduction <add>, %22, %cst_11 [1] : vector<16x32xf32> to vector<16xf32>
    %24 = vector.shape_cast %23 : vector<16xf32> to vector<16x1xf32>
    %cst_12 = arith.constant 3.200000e+01 : f32
    %25 = vector.broadcast %cst_12 : f32 to vector<16x1xf32>
    %26 = arith.divf %24, %25 : vector<16x1xf32>
    %27 = vector.broadcast %19 : vector<16x1xf32> to vector<16x32xf32>
    %28 = arith.subf %0, %27 : vector<16x32xf32>
    %cst_13 = arith.constant 9.99999974E-6 : f32
    %29 = vector.broadcast %cst_13 : f32 to vector<16x1xf32>
    %30 = arith.addf %26, %29 : vector<16x1xf32>
    %31 = math.rsqrt %30 : vector<16x1xf32>
    %32 = vector.broadcast %31 : vector<16x1xf32> to vector<16x32xf32>
    %33 = arith.mulf %28, %32 : vector<16x32xf32>
    %34 = vector.broadcast %9 : vector<1x32xf32> to vector<16x32xf32>
    %35 = arith.mulf %33, %34 : vector<16x32xf32>
    %36 = vector.broadcast %10 : vector<1x32xf32> to vector<16x32xf32>
    %37 = arith.addf %35, %36 : vector<16x32xf32>
    %cst_14 = arith.constant dense<0.000000e+00> : vector<16x96xf32>
    %38 = tpu.matmul %37, %1, %cst_14 {dimension_numbers = #tpu.dot_dimension_numbers<[1], [0], [0], [1], [0, 0, 1, 1], [], []>} : vector<16x32xf32>, vector<32x96xf32>, vector<16x96xf32> -> vector<16x96xf32>
    %39 = vector.extract_strided_slice %38 {offsets = [0, 0], sizes = [16, 32], strides = [1, 1]} : vector<16x96xf32> to vector<16x32xf32>
    %40 = vector.extract_strided_slice %38 {offsets = [0, 32], sizes = [16, 32], strides = [1, 1]} : vector<16x96xf32> to vector<16x32xf32>
    %41 = vector.extract_strided_slice %38 {offsets = [0, 64], sizes = [16, 32], strides = [1, 1]} : vector<16x96xf32> to vector<16x32xf32>
    %42 = vector.extract_strided_slice %40 {offsets = [0, 0], sizes = [8, 32], strides = [1, 1]} : vector<16x32xf32> to vector<8x32xf32>
    %43 = vector.extract_strided_slice %41 {offsets = [0, 0], sizes = [8, 32], strides = [1, 1]} : vector<16x32xf32> to vector<8x32xf32>
    %44 = tpu.concatenate %42, %42, %42, %42 in 0 : vector<8x32xf32>, vector<8x32xf32>, vector<8x32xf32>, vector<8x32xf32> -> vector<32x32xf32>
    %45 = arith.mulf %44, %14 : vector<32x32xf32>
    %46 = tpu.concatenate %43, %43, %43, %43 in 0 : vector<8x32xf32>, vector<8x32xf32>, vector<8x32xf32>, vector<8x32xf32> -> vector<32x32xf32>
    %47 = arith.mulf %46, %14 : vector<32x32xf32>
    %48 = vector.extract_strided_slice %39 {offsets = [0, 0], sizes = [8, 32], strides = [1, 1]} : vector<16x32xf32> to vector<8x32xf32>
    %cst_15 = arith.constant dense<0.000000e+00> : vector<8x32xf32>
    %49 = tpu.matmul %48, %45, %cst_15 {dimension_numbers = #tpu.dot_dimension_numbers<[1], [1], [0], [0], [0, 0, 1, 0], [], []>} : vector<8x32xf32>, vector<32x32xf32>, vector<8x32xf32> -> vector<8x32xf32>
    %50 = arith.addf %49, %13 : vector<8x32xf32>
    %cst_16 = arith.constant dense<0xFF800000> : vector<8xf32>
    %51 = vector.multi_reduction <maximumf>, %50, %cst_16 [1] : vector<8x32xf32> to vector<8xf32>
    %52 = vector.shape_cast %51 : vector<8xf32> to vector<8x1xf32>
    %53 = vector.broadcast %52 : vector<8x1xf32> to vector<8x32xf32>
    %54 = arith.subf %50, %53 : vector<8x32xf32>
    %55 = math.exp %54 : vector<8x32xf32>
    %cst_17 = arith.constant dense<0.000000e+00> : vector<8x32xf32>
    %56 = tpu.matmul %55, %15, %cst_17 {dimension_numbers = #tpu.dot_dimension_numbers<[1], [0], [0], [1], [0, 0, 1, 1], [], []>} : vector<8x32xf32>, vector<32x32xf32>, vector<8x32xf32> -> vector<8x32xf32>
    %57 = tpu.reciprocal %56 {approx = true} : vector<8x32xf32> -> vector<8x32xf32>
    %58 = arith.mulf %55, %57 : vector<8x32xf32>
    %cst_18 = arith.constant dense<0.000000e+00> : vector<8x32xf32>
    %59 = tpu.matmul %58, %47, %cst_18 {dimension_numbers = #tpu.dot_dimension_numbers<[1], [0], [0], [1], [0, 0, 1, 1], [], []>} : vector<8x32xf32>, vector<32x32xf32>, vector<8x32xf32> -> vector<8x32xf32>
    %60 = vector.extract_strided_slice %40 {offsets = [8, 0], sizes = [8, 32], strides = [1, 1]} : vector<16x32xf32> to vector<8x32xf32>
    %61 = vector.extract_strided_slice %41 {offsets = [8, 0], sizes = [8, 32], strides = [1, 1]} : vector<16x32xf32> to vector<8x32xf32>
    %62 = tpu.concatenate %60, %60, %60, %60 in 0 : vector<8x32xf32>, vector<8x32xf32>, vector<8x32xf32>, vector<8x32xf32> -> vector<32x32xf32>
    %63 = arith.mulf %62, %14 : vector<32x32xf32>
    %64 = tpu.concatenate %61, %61, %61, %61 in 0 : vector<8x32xf32>, vector<8x32xf32>, vector<8x32xf32>, vector<8x32xf32> -> vector<32x32xf32>
    %65 = arith.mulf %64, %14 : vector<32x32xf32>
    %66 = vector.extract_strided_slice %39 {offsets = [8, 0], sizes = [8, 32], strides = [1, 1]} : vector<16x32xf32> to vector<8x32xf32>
    %cst_19 = arith.constant dense<0.000000e+00> : vector<8x32xf32>
    %67 = tpu.matmul %66, %63, %cst_19 {dimension_numbers = #tpu.dot_dimension_numbers<[1], [1], [0], [0], [0, 0, 1, 0], [], []>} : vector<8x32xf32>, vector<32x32xf32>, vector<8x32xf32> -> vector<8x32xf32>
    %68 = arith.addf %67, %13 : vector<8x32xf32>
    %cst_20 = arith.constant dense<0xFF800000> : vector<8xf32>
    %69 = vector.multi_reduction <maximumf>, %68, %cst_20 [1] : vector<8x32xf32> to vector<8xf32>
    %70 = vector.shape_cast %69 : vector<8xf32> to vector<8x1xf32>
    %71 = vector.broadcast %70 : vector<8x1xf32> to vector<8x32xf32>
    %72 = arith.subf %68, %71 : vector<8x32xf32>
    %73 = math.exp %72 : vector<8x32xf32>
    %cst_21 = arith.constant dense<0.000000e+00> : vector<8x32xf32>
    %74 = tpu.matmul %73, %15, %cst_21 {dimension_numbers = #tpu.dot_dimension_numbers<[1], [0], [0], [1], [0, 0, 1, 1], [], []>} : vector<8x32xf32>, vector<32x32xf32>, vector<8x32xf32> -> vector<8x32xf32>
    %75 = tpu.reciprocal %74 {approx = true} : vector<8x32xf32> -> vector<8x32xf32>
    %76 = arith.mulf %73, %75 : vector<8x32xf32>
    %cst_22 = arith.constant dense<0.000000e+00> : vector<8x32xf32>
    %77 = tpu.matmul %76, %65, %cst_22 {dimension_numbers = #tpu.dot_dimension_numbers<[1], [0], [0], [1], [0, 0, 1, 1], [], []>} : vector<8x32xf32>, vector<32x32xf32>, vector<8x32xf32> -> vector<8x32xf32>
    %78 = tpu.concatenate %59, %77 in 0 : vector<8x32xf32>, vector<8x32xf32> -> vector<16x32xf32>
    %cst_23 = arith.constant dense<0.000000e+00> : vector<16x32xf32>
    %79 = tpu.matmul %78, %2, %cst_23 {dimension_numbers = #tpu.dot_dimension_numbers<[1], [0], [0], [1], [0, 0, 1, 1], [], []>} : vector<16x32xf32>, vector<32x32xf32>, vector<16x32xf32> -> vector<16x32xf32>
    %80 = arith.addf %0, %79 : vector<16x32xf32>
    %81 = vector.broadcast %7 : vector<1x32xf32> to vector<16x32xf32>
    %82 = arith.addf %80, %81 : vector<16x32xf32>
    %cst_24 = arith.constant dense<0.000000e+00> : vector<16xf32>
    %83 = vector.multi_reduction <add>, %82, %cst_24 [1] : vector<16x32xf32> to vector<16xf32>
    %84 = vector.shape_cast %83 : vector<16xf32> to vector<16x1xf32>
    %cst_25 = arith.constant 3.200000e+01 : f32
    %85 = vector.broadcast %cst_25 : f32 to vector<16x1xf32>
    %86 = arith.divf %84, %85 : vector<16x1xf32>
    %87 = vector.broadcast %86 : vector<16x1xf32> to vector<16x32xf32>
    %88 = arith.subf %82, %87 : vector<16x32xf32>
    %89 = arith.mulf %88, %88 : vector<16x32xf32>
    %cst_26 = arith.constant dense<0.000000e+00> : vector<16xf32>
    %90 = vector.multi_reduction <add>, %89, %cst_26 [1] : vector<16x32xf32> to vector<16xf32>
    %91 = vector.shape_cast %90 : vector<16xf32> to vector<16x1xf32>
    %cst_27 = arith.constant 3.200000e+01 : f32
    %92 = vector.broadcast %cst_27 : f32 to vector<16x1xf32>
    %93 = arith.divf %91, %92 : vector<16x1xf32>
    %94 = vector.broadcast %86 : vector<16x1xf32> to vector<16x32xf32>
    %95 = arith.subf %82, %94 : vector<16x32xf32>
    %cst_28 = arith.constant 9.99999974E-6 : f32
    %96 = vector.broadcast %cst_28 : f32 to vector<16x1xf32>
    %97 = arith.addf %93, %96 : vector<16x1xf32>
    %98 = math.rsqrt %97 : vector<16x1xf32>
    %99 = vector.broadcast %98 : vector<16x1xf32> to vector<16x32xf32>
    %100 = arith.mulf %95, %99 : vector<16x32xf32>
    %101 = vector.broadcast %11 : vector<1x32xf32> to vector<16x32xf32>
    %102 = arith.mulf %100, %101 : vector<16x32xf32>
    %103 = vector.broadcast %12 : vector<1x32xf32> to vector<16x32xf32>
    %104 = arith.addf %102, %103 : vector<16x32xf32>
    %cst_29 = arith.constant dense<0.000000e+00> : vector<16x128xf32>
    %105 = tpu.matmul %104, %3, %cst_29 {dimension_numbers = #tpu.dot_dimension_numbers<[1], [0], [0], [1], [0, 0, 1, 1], [], []>} : vector<16x32xf32>, vector<32x128xf32>, vector<16x128xf32> -> vector<16x128xf32>
    %106 = vector.broadcast %6 : vector<1x128xf32> to vector<16x128xf32>
    %107 = arith.addf %105, %106 : vector<16x128xf32>
    %cst_30 = arith.constant 0.000000e+00 : f32
    %108 = vector.broadcast %cst_30 : f32 to vector<16x128xf32>
    %109 = arith.maximumf %107, %108 : vector<16x128xf32>
    %cst_31 = arith.constant dense<0.000000e+00> : vector<16x32xf32>
    %110 = tpu.matmul %109, %4, %cst_31 {dimension_numbers = #tpu.dot_dimension_numbers<[1], [0], [0], [1], [0, 0, 1, 1], [], []>} : vector<16x128xf32>, vector<128x32xf32>, vector<16x32xf32> -> vector<16x32xf32>
    %111 = vector.broadcast %8 : vector<1x32xf32> to vector<16x32xf32>
    %112 = arith.addf %110, %111 : vector<16x32xf32>
    %113 = arith.addf %82, %112 : vector<16x32xf32>
    %c0_32 = arith.constant 0 : index
    %c0_33 = arith.constant 0 : index
    %114 = vector.load %arg2[%c0_32, %c0_33] : memref<16x32xf32, #tpu.memory_space<vmem>>, vector<16x32xf32>
    tpu.vector_store %arg2[%c0_32, %c0_33], %113 {strides = array<i32>} : memref<16x32xf32, #tpu.memory_space<vmem>>, vector<16x32xf32>,
    return
  }
}

</mosaic_0001>

<bundles_post_ra>
// kernel: transformer_block.1
= control target key start
LH: loop header
LB: loop body
LE: loop exit
PB: predicated region body
PF: predicated region fallthrough
CT: control target
= control target key end

     0   :  { %7 = vsyncpa [#allocation3], 0  ;;  %s1760_s0 = inlined_call_operand.hbm [shape: f32[16,32], index: 0, kind: input, shape index: {}]   ;;  %s1761_s1 = inlined_call_operand.hbm [shape: f32[304,128], index: 1, kind: input, shape index: {}]   ;;  %s1762_s2 = inlined_call_operand.hbm [shape: f32[16,32], index: 2, kind: output, shape index: {}]  }
   0x1   :  { %8 = vsyncpa [#allocation6], 0 }
   0x2   :  { %9 = vsyncpa [#allocation4], 0  ;;  %s1541_s9 = smov [#allocation2]   ;;  %s1469_s13 = scalar_lea.hbm %s1760_s0, 256 }
   0x3   :  { %s15_s10 = sshll.u32 %s1541_s9, 4  ;;  %p1470_p0 = scmp.ne.s32.totalorder %s1760_s0, %s1469_s13  ;;  %s16_s10 = int_to_ptr.vmem [resolvable:$true] %s15_s10 }
   0x4   :  { %p1473_p1 = scmp.lt.u32.totalorder %s1469_s13, %s1760_s0 }
   0x6   :  { %p1475_p2 = pnand %p1473_p1, %p1470_p0 }
   0x8   :  { %1478 = shalt.err (!%p1475_p2)
}
   0x9   :  { %s1479_s18 = scalar_lea.vmem %s16_s10, 256  ;;  %p1484_p4 = scmp.lt.s32.totalorder %s16_s10, %s16_s10 }
   0xa   :  { %p1480_p3 = scmp.ne.s32.totalorder %s16_s10, %s1479_s18  ;;  %p1485_p5 = scmp.lt.s32.totalorder %s1479_s18, %s1479_s18 }
   0xc   :  { %p1486_p6 = por %p1485_p5, %p1484_p4 }
   0xe   :  { %p1487_p7 = pnand %p1486_p6, %p1480_p3 }
  0x10   :  { %1490 = shalt.err (!%p1487_p7)
}
  0x11   :  { %s1542_s19 = smov 128   ;;  %s1543_s20 = smov 8  }
  0x12   :  { %21 = dma.hbm_to_vmem [thread:$0]  %s1760_s0, 256, %s16_s10, [#allocation3], %s1542_s19, %s1542_s19, %s1543_s20  }
  0x13   :  { %s1544_s23 = smov [#allocation5]   ;;  %s1491_s27 = scalar_lea.hbm %s1761_s1, 4864 }
  0x14   :  { %s27_s24 = sshll.u32 %s1544_s23, 4  ;;  %p1492_p8 = scmp.ne.s32.totalorder %s1761_s1, %s1491_s27  ;;  %s28_s24 = int_to_ptr.vmem [resolvable:$true] %s27_s24 }
  0x15   :  { %p1495_p9 = scmp.lt.u32.totalorder %s1491_s27, %s1761_s1 }
  0x17   :  { %p1497_p10 = pnand %p1495_p9, %p1492_p8 }
  0x19   :  { %1500 = shalt.err (!%p1497_p10)
}
  0x1a   :  { %s1501_s4 = scalar_lea.vmem %s28_s24, 4864  ;;  %p1506_p12 = scmp.lt.s32.totalorder %s28_s24, %s28_s24 }
  0x1b   :  { %p1502_p11 = scmp.ne.s32.totalorder %s28_s24, %s1501_s4  ;;  %p1507_p13 = scmp.lt.s32.totalorder %s1501_s4, %s1501_s4 }
  0x1d   :  { %p1508_p0 = por %p1507_p13, %p1506_p12 }
  0x1f   :  { %p1509_p1 = pnand %p1508_p0, %p1502_p11 }
  0x21   :  { %1512 = shalt.err (!%p1509_p1)
}
  0x22   :  { %33 = dma.hbm_to_vmem [thread:$0]  %s1761_s1, 4864, %s28_s24, [#allocation6], %s1542_s19, %s1542_s19, %s1543_s20  }
  0x23   :  { %1535 = dma.done.wait [#allocation3], 256  }
  0x24   :  { %1536 = vsyncadd [#allocation3], 4294967040 }
  0x25   :  { %1537 = dma.done.wait [#allocation6], 4864  }
  0x26   :  { %1538 = vsyncadd [#allocation6], 4294962432  ;;  %vm80_vm0 = vcmask 261120   ;;  %v1597_v0 = vld [vmem:[#allocation2] sm:$0xff]  ;;  %v1599_v1 = vld [vmem:[#allocation2 + $0x8] sm:$0xff]  ;;  %s1545_s1 = smov 32   ;;  %v108_v26 = vlaneseq }
  0x27   :  { %v81_v2 = vsel %vm80_vm0, %v1597_v0, 0.0  ;;  %v84_v3 = vsel %vm80_vm0, %v1599_v1, 0.0  ;;  %v42_v14 = vld [vmem:[#allocation5] sm:$0xff]  ;;  %v43_v15 = vld [vmem:[#allocation5 + $0x8] sm:$0xff]  ;;  %v44_v16 = vld [vmem:[#allocation5 + $0x10] sm:$0xff]  ;;  %v1546_v47 = vmov 0.0|0.0  }
  0x28   :  { %82 = vadd.xlane.f32.xlu0 %v81_v2  ;;  %v1306_v17 = vpack.c.bf16 %v43_v15, %v42_v14  ;;  %v45_v18 = vld [vmem:[#allocation5 + $0x18] sm:$0xff]  ;;  %v1611_v21 = vld [vmem:[#allocation5 + $0xf0] sm:$0xff]  ;;  %v74_v22 = vld [vmem:[#allocation5 + $0x100] sm:$0xff]  ;;  %v1615_v30 = vshrl.u32 %v108_v26, 7  ;;  %1334 = vmatprep.subr.bf16.mxu1 %v1546_v47  ;;  %s1547_s6 = smov 96   ;;  %vm1548_vm1 = vmmov 0  }
  0x29   :  { %v1310_v19 = vpack.c.bf16 %v45_v18, %v44_v16  ;;  %v1609_v20 = vld [vmem:[#allocation5 + $0xf8] sm:$0xff]  ;;  %v75_v23 = vld [vmem:[#allocation5 + $0x108] sm:$0xff]  ;;  %v1618_v33 = vld [vmem:[#allocation5 + $0xe0] sm:$0xff]  ;;  %v1549_v2 = vmov 0.0   ;;  %s1550_s7 = smov 64   ;;  %s1551_s8 = smov [#allocation7]  }
  0x2a   :  { %1307 = vmatprep.subr.bf16.mxu0 %v1306_v17  ;;  %v110_v32 = vsub.s32 3, %v1615_v30  ;;  %v116_v34 = vsub.s32 4, %v1615_v30  ;;  %1224 = vmatprep.mubr.msk.f32.mxu1 %vm1548_vm1, %v1549_v2  ;;  %vm1651_vm2 = vmpackc.low %vm80_vm0, %vm80_vm0  ;;  %s1073_s9 = sshll.u32 %s1551_s8, 4  ;;  %s1074_s9 = int_to_ptr.vmem [resolvable:$true] %s1073_s9 }
  0x2b   :  { %1309 = vmatpush3.bf16.msra.mxu0 %v1306_v17  ;;  %s1513_s10 = scalar_lea.vmem %s1074_s9, 256  ;;  %p1518_p3 = scmp.lt.s32.totalorder %s1074_s9, %s1074_s9 }
  0x2c   :  { %85 = vadd.xlane.f32.xlu0 %v84_v3  ;;  %1311 = vmatprep.subr.bf16.mxu0 %v1310_v19  ;;  %v111_v35 = vrot.slane %v1618_v33, %v110_v32  ;;  %v117_v38 = vrot.slane %v1618_v33, %v116_v34  ;;  %p1514_p2 = scmp.ne.s32.totalorder %s1074_s9, %s1513_s10  ;;  %p1519_p4 = scmp.lt.s32.totalorder %s1513_s10, %s1513_s10 }
  0x2e   :  { %p1520_p5 = por %p1519_p4, %p1518_p3 }
  0x2f   :  { %1313 = vmatpush3.bf16.msra.mxu0 %v1310_v19 }
  0x30   :  { %1314 = vmatprep.subr.bf16.mxu0 %v1546_v47  ;;  %p1521_p6 = pnand %p1520_p5, %p1514_p2 }
  0x42   :  { %205 = vrot.lane.b32.xlu0 %v1611_v21, %s1545_s1 }
  0xb5   :  { %v83_v4 = vpop.xlane.xlu0 %82 }
  0xb6   :  { %v88_v5 = vmul.f32 0.03125, %v83_v4 }
  0xb8   :  { %v90_v6 = vsub.f32 %v1597_v0, %v88_v5 }
  0xb9   :  { %v86_v7 = vpop.xlane.xlu0 %85 }
  0xba   :  { %v89_v8 = vmul.f32 0.03125, %v86_v7  ;;  %v92_v9 = vmul.f32 %v90_v6, %v90_v6 }
  0xbc   :  { %v91_v10 = vsub.f32 %v1599_v1, %v89_v8  ;;  %v94_v11 = vsel %vm80_vm0, %v92_v9, 0.0 }
  0xbd   :  { %95 = vadd.xlane.f32.xlu1 %v94_v11  ;;  %v206_v49 = vpop.permute.xlu0 %205 }
  0xbe   :  { %v93_v12 = vmul.f32 %v91_v10, %v91_v10 }
  0xc0   :  { %v97_v13 = vsel %vm80_vm0, %v93_v12, 0.0 }
  0xc1   :  { %98 = vadd.xlane.f32.xlu1 %v97_v13 }
  0xd2   :  { %207 = vrot.lane.b32.xlu1 %v1609_v20, %s1545_s1 }
  0xd6   :  { %209 = vrot.lane.b32.xlu1 %v74_v22, %s1545_s1 }
  0xda   :  { %211 = vrot.lane.b32.xlu1 %v75_v23, %s1545_s1 }
 0x14a   :  { %v96_v24 = vpop.xlane.xlu1 %95 }
 0x14b   :  { %v100_v25 = vmul.f32 0.03125, %v96_v24 }
 0x14d   :  { %v102_v27 = vadd.f32 1e-05, %v100_v25 }
 0x14e   :  { %v99_v28 = vpop.xlane.xlu1 %98 }
 0x14f   :  { %1453 = vrsqrt.f32 %v102_v27  ;;  %v101_v29 = vmul.f32 0.03125, %v99_v28 }
 0x151   :  { %v103_v31 = vadd.f32 1e-05, %v101_v29 }
 0x152   :  { %v208_v45 = vpop.permute.xlu1 %207 }
 0x153   :  { %1455 = vrsqrt.f32 %v103_v31 }
 0x156   :  { %v210_v46 = vpop.permute.xlu1 %209 }
 0x159   :  { %v1454_v36 = vpop.eup %1453 }
 0x15a   :  { %v106_v37 = vmul.f32 %v1454_v36, %v90_v6  ;;  %v212_v48 = vpop.permute.xlu1 %211 }
 0x15c   :  { %v112_v39 = vmul.f32 %v111_v35, %v106_v37 }
 0x15d   :  { %v1456_v40 = vpop.eup %1455 }
 0x15e   :  { %v107_v41 = vmul.f32 %v1456_v40, %v91_v10  ;;  %v118_v42 = vadd.f32 %v117_v38, %v112_v39  ;;  %v76_v39 = vld [vmem:[#allocation5 + $0x110] sm:$0xff]  ;;  %v77_v40 = vld [vmem:[#allocation5 + $0x118] sm:$0xff] }
 0x160   :  { %v113_v43 = vmul.f32 %v111_v35, %v107_v41  ;;  %1180 = vmatprep.mubr.msk.f32.mxu0 %vm80_vm0, %v118_v42  ;;  %v1323_v42 = vpack.c.bf16 %v77_v40, %v76_v39 }
 0x162   :  { %v119_v44 = vadd.f32 %v117_v38, %v113_v43 }
 0x164   :  { %1181 = vmatmul.mubr.msk.f32.vlgmr.msra.gmra.mrb[0].mxu0 %vm80_vm0, %v119_v44 }
 0x165   :  { %1191 = vmatprep.mubr.msk.f32.mxu0 %vm1548_vm1, %v1549_v2 }
 0x237   :  { %v1627_v50 = vpop.f32.mrb[0].mxu0 }
 0x238   :  { %v1629_v51 = vpop.f32.mrb[1].mxu0  ;;  %v502_v56 = vmul.f32 %v1627_v50, %v210_v46  ;;  %v503_v57 = vmul.f32 %v1627_v50, %v212_v48  ;;  %v501_v58 = vmul.f32 %v1627_v50, %v208_v45  ;;  %v500_v59 = vmul.f32 %v1627_v50, %v206_v49 }
 0x239   :  { %v219_v52 = vmul.f32 %v210_v46, %v1629_v51  ;;  %v220_v53 = vmul.f32 %v212_v48, %v1629_v51  ;;  %v217_v54 = vmul.f32 %v206_v49, %v1629_v51  ;;  %v218_v55 = vmul.f32 %v208_v45, %v1629_v51  ;;  %v78_v46 = vld [vmem:[#allocation5 + $0x120] sm:$0xff]  ;;  %v79_v48 = vld [vmem:[#allocation5 + $0x128] sm:$0xff] }
 0x23a   :  { %v1428_v62 = vpack.i.bf16 %v503_v57, %v502_v56  ;;  %v1423_v63 = vpack.i.bf16 %v501_v58, %v500_v59 }
 0x23b   :  { %v1418_v60 = vpack.i.bf16 %v220_v53, %v219_v52  ;;  %v1413_v61 = vpack.i.bf16 %v218_v55, %v217_v54  ;;  %v1326_v53 = vpack.c.bf16 %v79_v48, %v78_v46 }
 0x23d   :  { %1419 = vrot.lane.b32.xlu1 %v1418_v60, %s1547_s6  ;;  %1414 = vrot.lane.b32.xlu0 %v1413_v61, %s1547_s6 }
 0x241   :  { %1429 = vrot.lane.b32.xlu1 %v1428_v62, %s1547_s6  ;;  %1424 = vrot.lane.b32.xlu0 %v1423_v63, %s1547_s6 }
 0x245   :  { %221 = vrot.lane.b32.xlu1 %v1611_v21, %s1550_s7 }
 0x249   :  { %223 = vrot.lane.b32.xlu1 %v1609_v20, %s1550_s7  ;;  %v71_v20 = vld [vmem:[#allocation5 + $0xe8] sm:$0xff] }
 0x24d   :  { %225 = vrot.lane.b32.xlu1 %v74_v22, %s1550_s7 }
 0x251   :  { %227 = vrot.lane.b32.xlu1 %v75_v23, %s1550_s7 }
 0x2af   :  { %v1415_v3 = vpop.permute.xlu0 %1414  ;;  %v1420_v6 = vpop.permute.xlu1 %1419 }
 0x2b0   :  { %v1417_v4 = vunpack.i.h.bf16 %v1415_v3  ;;  %v1416_v5 = vunpack.i.l.bf16 %v1415_v3  ;;  %v1422_v12 = vunpack.i.h.bf16 %v1420_v6  ;;  %v1421_v13 = vunpack.i.l.bf16 %v1420_v6 }
 0x2b2   :  { %v1315_v8 = vpack.c.bf16 %v1417_v4, %v1416_v5  ;;  %v1319_v16 = vpack.c.bf16 %v1422_v12, %v1421_v13 }
 0x2b3   :  { %v1425_v9 = vpop.permute.xlu0 %1424  ;;  %v1430_v15 = vpop.permute.xlu1 %1429 }
 0x2b4   :  { %v1427_v10 = vunpack.i.h.bf16 %v1425_v9  ;;  %v1426_v11 = vunpack.i.l.bf16 %v1425_v9  ;;  %1317 = vmatpush3.bf16.xpose.msk.msra.mxu0 %vm1651_vm2, %v1315_v8  ;;  %v1432_v17 = vunpack.i.h.bf16 %v1430_v15  ;;  %v1431_v18 = vunpack.i.l.bf16 %v1430_v15 }
 0x2b5   :  { %1318 = vmatprep.subr.bf16.mxu0 %v1546_v47 }
 0x2b6   :  { %v1335_v14 = vpack.c.bf16 %v1427_v10, %v1426_v11  ;;  %v1339_v19 = vpack.c.bf16 %v1432_v17, %v1431_v18 }
 0x2b7   :  { %v222_v24 = vpop.permute.xlu1 %221 }
 0x2b8   :  { %1337 = vmatpush3.bf16.xpose.msk.msra.mxu1 %vm1651_vm2, %v1335_v14  ;;  %v504_v36 = vmul.f32 %v1627_v50, %v222_v24  ;;  %v233_v38 = vmul.f32 %v222_v24, %v1629_v51 }
 0x2b9   :  { %1338 = vmatprep.subr.bf16.mxu1 %v1546_v47 }
 0x2bb   :  { %v224_v31 = vpop.permute.xlu1 %223 }
 0x2bc   :  { %1321 = vmatpush3.bf16.xpose.msk.msra.mxu0 %vm1651_vm2, %v1319_v16  ;;  %v505_v34 = vmul.f32 %v1627_v50, %v224_v31  ;;  %v234_v35 = vmul.f32 %v224_v31, %v1629_v51 }
 0x2bd   :  { %1322 = vmatprep.subr.bf16.mxu0 %v1546_v47 }
 0x2be   :  { %v1443_v41 = vpack.i.bf16 %v505_v34, %v504_v36  ;;  %v1433_v43 = vpack.i.bf16 %v234_v35, %v233_v38  ;;  %v856_v35 = vsub.s32 1, %v1615_v30 }
 0x2bf   :  { %v226_v32 = vpop.permute.xlu1 %225 }
 0x2c0   :  { %1341 = vmatpush3.bf16.xpose.msk.msra.mxu1 %vm1651_vm2, %v1339_v19  ;;  %v235_v45 = vmul.f32 %v226_v32, %v1629_v51  ;;  %v506_v54 = vmul.f32 %v1627_v50, %v226_v32  ;;  %v857_v36 = vrot.slane %v1618_v33, %v856_v35 }
 0x2c3   :  { %1192 = vmatmul.mubr.msk.f32.vlgmr.msra.gmra.mrb[2].mxu0 %vm80_vm0, %v1629_v51  ;;  %v228_v37 = vpop.permute.xlu1 %227 }
 0x2c4   :  { %1202 = vmatprep.mubr.msk.f32.mxu0 %vm1548_vm1, %v1549_v2  ;;  %v236_v44 = vmul.f32 %v228_v37, %v1629_v51  ;;  %1324 = vmatpush3.bf16.msra.mxu0 %v1323_v42  ;;  %v507_v49 = vmul.f32 %v1627_v50, %v228_v37 }
 0x2c5   :  { %1325 = vmatprep.subr.bf16.mxu0 %v1546_v47 }
 0x2c6   :  { %v1438_v52 = vpack.i.bf16 %v236_v44, %v235_v45  ;;  %v1448_v55 = vpack.i.bf16 %v507_v49, %v506_v54 }
 0x2c7   :  { %1225 = vmatmul.mubr.msk.f32.vlgmr.msra.gmra.mrb[0].mxu1 %vm80_vm0, %v1627_v50 }
 0x2c8   :  { %1327 = vmatpush3.bf16.msra.mxu0 %v1326_v53 }
 0x2c9   :  { %1328 = vmatprep.subr.bf16.mxu0 %v1546_v47 }
 0x396   :  { %v326_v21 = vpop.f32.mrb[2].mxu0 }
 0x397   :  { %v327_v22 = vadd.f32 %v326_v21, %v71_v20  ;;  %v1193_v23 = vpop.f32.mrb[3].mxu0  ;;  %v46_v21 = vld [vmem:[#allocation5 + $0x20] sm:$0xff] }
 0x398   :  { %v48_v23 = vld [vmem:[#allocation5 + $0x30] sm:$0xff] }
 0x399   :  { %v330_v25 = vsel %vm80_vm0, %v327_v22, -inf }
 0x39a   :  { %v597_v26 = vpop.f32.mrb[0].mxu1  ;;  %331 = vmax.xlane.f32.xlu0 %v330_v25  ;;  %v49_v25 = vld [vmem:[#allocation5 + $0x38] sm:$0xff] }
 0x39b   :  { %v598_v27 = vadd.f32 %v597_v26, %v71_v20  ;;  %v1226_v28 = vpop.f32.mrb[1].mxu1  ;;  %v1358_v26 = vpack.c.bf16 %v49_v25, %v48_v23 }
 0x39d   :  { %v601_v29 = vsel %vm80_vm0, %v598_v27, -inf }
 0x39e   :  { %602 = vmax.xlane.f32.xlu1 %v601_v29 }
 0x3af   :  { %1444 = vrot.lane.b32.xlu1 %v1443_v41, %s1550_s7 }
 0x3b0   :  { %1434 = vrot.lane.b32.xlu0 %v1433_v43, %s1550_s7 }
 0x3b4   :  { %1439 = vrot.lane.b32.xlu0 %v1438_v52, %s1550_s7 }
 0x3b8   :  { %1449 = vrot.lane.b32.xlu0 %v1448_v55, %s1550_s7 }
 0x427   :  { %v332_v51 = vpop.xlane.xlu0 %331 }
 0x428   :  { %v333_v56 = vsub.f32 %v327_v22, %v332_v51  ;;  %v47_v22 = vld [vmem:[#allocation5 + $0x28] sm:$0xff]  ;;  %v50_v51 = vld [vmem:[#allocation5 + $0x40] sm:$0xff] }
 0x429   :  { %v1354_v24 = vpack.c.bf16 %v47_v22, %v46_v21 }
 0x42a   :  { %v334_v57 = vmul.f32 1.442695, %v333_v56  ;;  %v51_v56 = vld [vmem:[#allocation5 + $0x48] sm:$0xff] }
 0x42b   :  { %v1435_v58 = vpop.permute.xlu0 %1434  ;;  %v603_v5 = vpop.xlane.xlu1 %602  ;;  %1355 = vmatprep.subr.bf16.mxu1 %v1354_v24 }
 0x42c   :  { %1457 = vpow2.f32 %v334_v57  ;;  %v1437_v59 = vunpack.i.h.bf16 %v1435_v58  ;;  %v1436_v60 = vunpack.i.l.bf16 %v1435_v58  ;;  %v604_v8 = vsub.f32 %v598_v27, %v603_v5  ;;  %1357 = vmatpush3.bf16.msra.mxu1 %v1354_v24  ;;  %v52_v58 = vld [vmem:[#allocation5 + $0x50] sm:$0xff]  ;;  %v58_v5 = vld [vmem:[#allocation5 + $0x80] sm:$0xff] }
 0x42d   :  { %1359 = vmatprep.subr.bf16.mxu1 %v1358_v26  ;;  %v1362_v57 = vpack.c.bf16 %v51_v56, %v50_v51 }
 0x42e   :  { %v1329_v63 = vpack.c.bf16 %v1437_v59, %v1436_v60  ;;  %v605_v9 = vmul.f32 1.442695, %v604_v8  ;;  %v53_v59 = vld [vmem:[#allocation5 + $0x58] sm:$0xff]  ;;  %v60_v8 = vld [vmem:[#allocation5 + $0x90] sm:$0xff] }
 0x42f   :  { %v1440_v61 = vpop.permute.xlu0 %1439  ;;  %v1445_v12 = vpop.permute.xlu1 %1444  ;;  %v1366_v60 = vpack.c.bf16 %v53_v59, %v52_v58 }
 0x430   :  { %v1442_v3 = vunpack.i.h.bf16 %v1440_v61  ;;  %v1441_v50 = vunpack.i.l.bf16 %v1440_v61  ;;  %v1447_v13 = vunpack.i.h.bf16 %v1445_v12  ;;  %v1446_v14 = vunpack.i.l.bf16 %v1445_v12  ;;  %1361 = vmatpush3.bf16.msra.mxu1 %v1358_v26  ;;  %v54_v61 = vld [vmem:[#allocation5 + $0x60] sm:$0xff]  ;;  %v63_v12 = vld [vmem:[#allocation5 + $0xa8] sm:$0xff] }
 0x431   :  { %v888_v26 = vsub.s32 5, %v1615_v30 }
 0x432   :  { %v1332_v4 = vpack.c.bf16 %v1442_v3, %v1441_v50  ;;  %v1349_v17 = vpack.c.bf16 %v1447_v13, %v1446_v14  ;;  %v57_v50 = vld [vmem:[#allocation5 + $0x78] sm:$0xff]  ;;  %v64_v14 = vld [vmem:[#allocation5 + $0xb0] sm:$0xff] }
 0x433   :  { %v1450_v15 = vpop.permute.xlu0 %1449 }
 0x434   :  { %v1452_v18 = vunpack.i.h.bf16 %v1450_v15  ;;  %v1451_v19 = vunpack.i.l.bf16 %v1450_v15  ;;  %v65_v15 = vld [vmem:[#allocation5 + $0xb8] sm:$0xff] }
 0x436   :  { %v1458_v62 = vpop.eup %1457  ;;  %v1352_v20 = vpack.c.bf16 %v1452_v18, %v1451_v19  ;;  %v67_v18 = vld [vmem:[#allocation5 + $0xc8] sm:$0xff] }
 0x437   :  { %1203 = vmatmul.mubr.msk.f32.vlgmr.msra.gmra.mrb[4].mxu0 %vm80_vm0, %v1458_v62 }
 0x438   :  { %1330 = vmatpush3.bf16.msra.mxu0 %v1329_v63  ;;  %1213 = vmatprep.mubr.msk.f32.mxu0 %vm1548_vm1, %v1549_v2  ;;  %v56_v63 = vld [vmem:[#allocation5 + $0x70] sm:$0xff] }
 0x439   :  { %1331 = vmatprep.subr.bf16.mxu0 %v1546_v47 }
 0x43c   :  { %1333 = vmatpush3.bf16.msra.mxu0 %v1332_v4  ;;  %v1374_v4 = vpack.c.bf16 %v57_v50, %v56_v63 }
 0x43d   :  { %1342 = vmatprep.subr.bf16.mxu0 %v1546_v47 }
 0x50a   :  { %v405_v6 = vpop.f32.mrb[4].mxu0 }
 0x50b   :  { %1459 = vrcp.f32 %v405_v6  ;;  %v1204_v7 = vpop.f32.mrb[5].mxu0  ;;  %v59_v6 = vld [vmem:[#allocation5 + $0x88] sm:$0xff] }
 0x50c   :  { %1461 = vpow2.f32 %v605_v9  ;;  %v1378_v7 = vpack.c.bf16 %v59_v6, %v58_v5  ;;  %v61_v9 = vld [vmem:[#allocation5 + $0x98] sm:$0xff] }
 0x515   :  { %v1460_v10 = vpop.eup %1459 }
 0x516   :  { %v410_v11 = vmul.f32 %v1460_v10, %v1458_v62  ;;  %v1462_v16 = vpop.eup %1461  ;;  %v55_v62 = vld [vmem:[#allocation5 + $0x68] sm:$0xff]  ;;  %v1382_v10 = vpack.c.bf16 %v61_v9, %v60_v8 }
 0x517   :  { %v1370_v3 = vpack.c.bf16 %v55_v62, %v54_v61 }
 0x518   :  { %1214 = vmatmul.mubr.msk.f32.vlgmr.msra.gmra.mrb[6].mxu0 %vm80_vm0, %v410_v11  ;;  %v62_v11 = vld [vmem:[#allocation5 + $0xa0] sm:$0xff] }
 0x519   :  { %1344 = vmatpush3.bf16.msra.mxu0 %v1323_v42  ;;  %1235 = vmatprep.mubr.msk.f32.mxu0 %vm1548_vm1, %v1549_v2  ;;  %v1386_v13 = vpack.c.bf16 %v63_v12, %v62_v11 }
 0x51a   :  { %1345 = vmatprep.subr.bf16.mxu0 %v1546_v47  ;;  %1371 = vmatprep.subr.bf16.mxu1 %v1370_v3 }
 0x51d   :  { %1347 = vmatpush3.bf16.msra.mxu0 %v1326_v53 }
 0x51e   :  { %1348 = vmatprep.subr.bf16.mxu0 %v1546_v47 }
 0x520   :  { %1236 = vmatmul.mubr.msk.f32.vlgmr.msra.gmra.mrb[8].mxu0 %vm80_vm0, %v1462_v16 }
 0x521   :  { %1350 = vmatpush3.bf16.msra.mxu0 %v1349_v17  ;;  %1246 = vmatprep.mubr.msk.f32.mxu0 %vm1548_vm1, %v1549_v2  ;;  %v66_v17 = vld [vmem:[#allocation5 + $0xc0] sm:$0xff] }
 0x522   :  { %1351 = vmatprep.subr.bf16.mxu0 %v1546_v47  ;;  %v1394_v19 = vpack.c.bf16 %v67_v18, %v66_v17 }
 0x525   :  { %1353 = vmatpush3.bf16.msra.mxu0 %v1352_v20 }
 0x526   :  { %1363 = vmatprep.subr.bf16.mxu0 %v1362_v57 }
 0x5eb   :  { %v496_v27 = vpop.f32.mrb[6].mxu0 }
 0x5ec   :  { %v1215_v28 = vpop.f32.mrb[7].mxu0  ;;  %1257 = vmatprep.mubr.msk.f32.mxu1 %vm80_vm0, %v496_v27  ;;  %v894_v27 = vsub.s32 6, %v1615_v30 }
 0x5ed   :  { %v889_v28 = vrot.slane %v1618_v33, %v888_v26 }
 0x5f3   :  { %v676_v29 = vpop.f32.mrb[8].mxu0 }
 0x5f4   :  { %1463 = vrcp.f32 %v676_v29  ;;  %v1237_v2 = vpop.f32.mrb[9].mxu0 }
 0x5fe   :  { %v1464_v47 = vpop.eup %1463 }
 0x5ff   :  { %v681_v31 = vmul.f32 %v1464_v47, %v1462_v16  ;;  %v1390_v16 = vpack.c.bf16 %v65_v15, %v64_v14  ;;  %v895_v47 = vrot.slane %v1618_v33, %v894_v27 }
 0x601   :  { %1247 = vmatmul.mubr.msk.f32.vlgmr.msra.gmra.mrb[10].mxu0 %vm80_vm0, %v681_v31 }
 0x602   :  { %1365 = vmatpush3.bf16.msra.mxu0 %v1362_v57 }
 0x603   :  { %1367 = vmatprep.subr.bf16.mxu0 %v1366_v60 }
 0x606   :  { %1369 = vmatpush3.bf16.msra.mxu0 %v1366_v60 }
 0x6d4   :  { %v767_v32 = vpop.f32.mrb[10].mxu0 }
 0x6d5   :  { %v1248_v34 = vpop.f32.mrb[11].mxu0  ;;  %1258 = vmatmul.mubr.msk.f32.vlgmr.msra.gmra.mrb[2].mxu1 %vm80_vm0, %v767_v32 }
 0x6d6   :  { %1373 = vmatpush3.bf16.msra.mxu1 %v1370_v3 }
 0x6d7   :  { %1375 = vmatprep.subr.bf16.mxu1 %v1374_v4 }
 0x6da   :  { %1377 = vmatpush3.bf16.msra.mxu1 %v1374_v4 }
 0x6db   :  { %1379 = vmatprep.subr.bf16.mxu1 %v1378_v7 }
 0x6de   :  { %1381 = vmatpush3.bf16.msra.mxu1 %v1378_v7 }
 0x6df   :  { %1383 = vmatprep.subr.bf16.mxu1 %v1382_v10 }
 0x6e2   :  { %1385 = vmatpush3.bf16.msra.mxu1 %v1382_v10 }
 0x6e3   :  { %1387 = vmatprep.subr.bf16.mxu1 %v1386_v13 }
 0x6e6   :  { %1389 = vmatpush3.bf16.msra.mxu1 %v1386_v13 }
 0x6e7   :  { %1391 = vmatprep.subr.bf16.mxu1 %v1390_v16 }
 0x6ea   :  { %1393 = vmatpush3.bf16.msra.mxu1 %v1390_v16 }
 0x6eb   :  { %1395 = vmatprep.subr.bf16.mxu1 %v1394_v19 }
 0x6ee   :  { %1397 = vmatpush3.bf16.msra.mxu1 %v1394_v19 }
 0x7a8   :  { %v1259_v37 = vpop.f32.mrb[2].mxu1 }
 0x7a9   :  { %v853_v38 = vadd.f32 %v1259_v37, %v1599_v1  ;;  %v843_v39 = vpop.f32.mrb[3].mxu1 }
 0x7aa   :  { %v852_v40 = vadd.f32 %v843_v39, %v1597_v0  ;;  %v69_v39 = vld [vmem:[#allocation5 + $0xd8] sm:$0xff] }
 0x7ab   :  { %v1709_v41 = vadd.f32 %v857_v36, %v853_v38  ;;  %v68_v38 = vld [vmem:[#allocation5 + $0xd0] sm:$0xff] }
 0x7ac   :  { %v1711_v42 = vadd.f32 %v857_v36, %v852_v40  ;;  %v1398_v40 = vpack.c.bf16 %v69_v39, %v68_v38 }
 0x7ad   :  { %v863_v43 = vsel %vm80_vm0, %v1709_v41, 0.0 }
 0x7ae   :  { %864 = vadd.xlane.f32.xlu1 %v863_v43  ;;  %v860_v44 = vsel %vm80_vm0, %v1711_v42, 0.0  ;;  %1399 = vmatprep.subr.bf16.mxu1 %v1398_v40  ;;  %v900_v43 = vsub.s32 0, %v1615_v30 }
 0x7af   :  { %861 = vadd.xlane.f32.xlu0 %v860_v44  ;;  %1401 = vmatpush3.bf16.msra.mxu1 %v1398_v40 }
 0x7b0   :  { %v901_v44 = vrot.slane %v1618_v33, %v900_v43 }
 0x83b   :  { %v865_v45 = vpop.xlane.xlu1 %864 }
 0x83c   :  { %v867_v46 = vmul.f32 0.03125, %v865_v45  ;;  %v862_v48 = vpop.xlane.xlu0 %861 }
 0x83d   :  { %v866_v49 = vmul.f32 0.03125, %v862_v48 }
 0x83e   :  { %v1718_v1 = vsub.f32 %v1709_v41, %v867_v46 }
 0x83f   :  { %v1721_v0 = vsub.f32 %v1711_v42, %v866_v49 }
 0x840   :  { %v871_v54 = vmul.f32 %v1718_v1, %v1718_v1 }
 0x841   :  { %v870_v52 = vmul.f32 %v1721_v0, %v1721_v0 }
 0x842   :  { %v875_v55 = vsel %vm80_vm0, %v871_v54, 0.0 }
 0x843   :  { %v872_v53 = vsel %vm80_vm0, %v870_v52, 0.0  ;;  %v987_v52 = vsub.s32 2, %v1615_v30 }
 0x844   :  { %873 = vadd.xlane.f32.xlu0 %v872_v53 }
 0x845   :  { %v988_v53 = vrot.slane %v1618_v33, %v987_v52 }
 0x848   :  { %876 = vadd.xlane.f32.xlu0 %v875_v55 }
 0x8d1   :  { %v874_v20 = vpop.xlane.xlu0 %873 }
 0x8d2   :  { %v878_v21 = vmul.f32 0.03125, %v874_v20 }
 0x8d4   :  { %v880_v22 = vadd.f32 1e-05, %v878_v21 }
 0x8d5   :  { %v877_v23 = vpop.xlane.xlu0 %876 }
 0x8d6   :  { %1465 = vrsqrt.f32 %v880_v22  ;;  %v879_v24 = vmul.f32 0.03125, %v877_v23 }
 0x8d8   :  { %v881_v25 = vadd.f32 1e-05, %v879_v24 }
 0x8da   :  { %1467 = vrsqrt.f32 %v881_v25 }
 0x8e0   :  { %v1466_v29 = vpop.eup %1465 }
 0x8e1   :  { %v884_v2 = vmul.f32 %v1466_v29, %v1721_v0 }
 0x8e3   :  { %v890_v31 = vmul.f32 %v889_v28, %v884_v2 }
 0x8e4   :  { %v1468_v32 = vpop.eup %1467 }
 0x8e5   :  { %v885_v34 = vmul.f32 %v1468_v32, %v1718_v1  ;;  %v896_v35 = vadd.f32 %v895_v47, %v890_v31 }
 0x8e7   :  { %v891_v36 = vmul.f32 %v889_v28, %v885_v34  ;;  %1268 = vmatprep.mubr.msk.f32.mxu0 %vm80_vm0, %v896_v35 }
 0x8e9   :  { %v897_v37 = vadd.f32 %v895_v47, %v891_v36 }
 0x8eb   :  { %1269 = vmatmul.mubr.msk.f32.vlgmr.msra.gmra.mrb[12].mxu0 %vm80_vm0, %v897_v37 }
 0x9be   :  { %v1270_v45 = vpop.f32.mrb[12].mxu0 }
 0x9bf   :  { %v980_v46 = vadd.f32 %v1270_v45, %v901_v44  ;;  %v974_v48 = vpop.f32.mrb[13].mxu0 }
 0x9c0   :  { %v975_v49 = vadd.f32 %v974_v48, %v901_v44 }
 0x9c1   :  { %v984_v0 = vmax.f32 %v980_v46, 0.0 }
 0x9c2   :  { %v983_v1 = vmax.f32 %v975_v49, 0.0 }
 0x9c4   :  { %1303 = vmatprep.mubr.f32.mxu1 %v983_v1 }
 0x9c5   :  { %1304 = vmatmul.mubr.f32.vlgmr.msra.gmra.mrb[4].mxu1 %v984_v0 }
 0xa98   :  { %v1305_v54 = vpop.f32.mrb[4].mxu1 }
 0xa99   :  { %v1061_v55 = vadd.f32 %v1305_v54, %v988_v53  ;;  %v1055_v51 = vpop.f32.mrb[5].mxu1 }
 0xa9a   :  { %v1056_v56 = vadd.f32 %v1055_v51, %v988_v53 }
 0xa9b   :  { %v1065_v57 = vadd.f32 %v1061_v55, %v1709_v41 }
 0xa9c   :  { %v1064_v58 = vadd.f32 %v1056_v56, %v1711_v42 }
 0xa9d   :  { %1067 = vst.msk [vmem:[#allocation7 + $0x8] sm:$0xff] %vm80_vm0, %v1065_v57 }
 0xa9e   :  { %1066 = vst.msk [vmem:[#allocation7] sm:$0xff] %vm80_vm0, %v1064_v58 }
 0xa9f   :  { %1524 = shalt.err (!%p1521_p6)
}
 0xaa0   :  { %s1525_s13 = scalar_lea.hbm %s1762_s2, 256 }
 0xaa1   :  { %p1526_p7 = scmp.ne.s32.totalorder %s1762_s2, %s1525_s13  ;;  %p1529_p8 = scmp.lt.u32.totalorder %s1525_s13, %s1762_s2 }
 0xaa3   :  { %p1531_p9 = pnand %p1529_p8, %p1526_p7 }
 0xaa5   :  { %1534 = shalt.err (!%p1531_p9)
}
 0xaa6   :  { %1079 = dma.vmem_to_hbm [thread:$0]  %s1074_s9, 256, %s1762_s2, [#allocation4], %s1542_s19, %s1542_s19, %s1543_s20  }
 0xaa7   :  { %1539 = dma.done.wait [#allocation4], 256  }
 0xaa8   :  { %1540 = vsyncadd [#allocation4], 4294967040 }
 0xaa9   :  { %1083 = vsyncpa [#allocation3], 1 }
 0xaaa   :  { %1084 = vsyncpa [#allocation6], 1 }
 0xaab   :  { %1085 = vsyncpa [#allocation4], 1 }

</bundles_post_ra>
